<compile_context>
chip_gen: v5e
topology: v5e:2x2
jax: 0.10.0
libtpu: 0.0.40
codegen_flags: <defaults>
</compile_context>

<pallas_src>
import functools
import numpy as np

import jax
import jax.numpy as jnp
from jax.experimental import pallas as pl
from jax.experimental.pallas import tpu as pltpu


def _create_gaussian_kernel_2d(size: int, sigma: float) -> jnp.ndarray:
    """2D Gaussian kernel, identical math to GaussianBlur._create_kernel (reference only)."""
    center = size // 2
    ii = np.arange(size, dtype=np.float32)[:, None]
    jj = np.arange(size, dtype=np.float32)[None, :]
    k = np.exp(-((ii - center) ** 2 + (jj - center) ** 2) / (2.0 * sigma ** 2))
    k = k / k.sum()
    return jnp.asarray(k, dtype=jnp.float32)


def _gaussian_weights_1d(size: int, sigma: float):
    """Normalized 1D Gaussian such that outer(g, g) == the 2D kernel above (exactly)."""
    center = size // 2
    d = np.arange(size, dtype=np.float64) - center
    g = np.exp(-(d ** 2) / (2.0 * float(sigma) ** 2))
    g = g / g.sum()
    return tuple(float(v) for v in g)  # baked into the kernel as constants


def _blur_kernel(x_ref, o_ref, buf_ref, *, w1d, pad, H, W):
    # x_ref:   (B, H, W)          VMEM input tile (unpadded)
    # o_ref:   (B, H, W)          VMEM output tile
    # buf_ref: (B, H+2p, W+2p)    VMEM scratch, zero-padded staging buffer
    B = x_ref.shape[0]
    K = len(w1d)

    # Re-zero only the thin padded border strips every step (cheap; robust
    # under megacore sharding of the parallel grid axis where program_id==0
    # may never run on a given core).  Corners are never read.
    if pad > 0:
        zcol = jnp.zeros((B, H, pad), jnp.float32)
        buf_ref[:, pad:pad + H, 0:pad] = zcol
        buf_ref[:, pad:pad + H, pad + W:pad + W + pad] = zcol
        zrow = jnp.zeros((B, pad, W), jnp.float32)
        buf_ref[:, 0:pad, pad:pad + W] = zrow
        buf_ref[:, pad + H:pad + H + pad, pad:pad + W] = zrow

    # Stage the input tile into the interior of the padded scratch.
    x = x_ref[...]
    if x.dtype != jnp.float32:
        x = x.astype(jnp.float32)
    buf_ref[:, pad:pad + H, pad:pad + W] = x

    # Pass 1: horizontal (lane-axis) 1-D convolution, K taps (trace-time unrolled).
    acc = w1d[0] * buf_ref[:, pad:pad + H, 0:W]
    for j in range(1, K):
        acc = acc + w1d[j] * buf_ref[:, pad:pad + H, j:j + W]
    # Overwrite the interior in place (acc is fully materialized before the store;
    # padded rows stay zero for the vertical pass).
    buf_ref[:, pad:pad + H, pad:pad + W] = acc

    # Pass 2: vertical (sublane-axis) 1-D convolution, K taps.
    out = w1d[0] * buf_ref[:, 0:H, pad:pad + W]
    for i in range(1, K):
        out = out + w1d[i] * buf_ref[:, i:i + H, pad:pad + W]
    o_ref[...] = out.astype(o_ref.dtype)


def _choose_channel_block(NC: int, H: int, W: int, pad: int,
                          budget_bytes: int = 8 * 1024 * 1024) -> int:
    """Largest divisor of NC whose VMEM footprint fits the budget and keeps >=2 grid steps."""
    Hp, Wp = H + 2 * pad, W + 2 * pad
    # double-buffered in + out blocks (f32) + the single f32 padded scratch, per batched image
    per_img = 4 * (2 * 2 * H * W + Hp * Wp)
    max_b = max(1, budget_bytes // per_img)
    cap = NC if NC < 2 else max(1, NC // 2)  # leave >=2 grid steps for v7x's 2 TCs
    b = int(min(max_b, cap, NC))
    while NC % b:
        b -= 1
    return max(1, b)


def gaussian_blur(x: jnp.ndarray, size: int = 5, sigma: float = 1.0) -> jnp.ndarray:
    """Equivalent of GaussianBlur(size, sigma).forward(x) for NCHW input (size must be odd)."""
    assert size % 2 == 1, "kernel size must be odd to preserve spatial shape"
    N, C, H, W = x.shape
    pad = size // 2
    Hp, Wp = H + 2 * pad, W + 2 * pad
    NC = N * C

    w1d = _gaussian_weights_1d(size, sigma)
    B = _choose_channel_block(NC, H, W, pad)
    grid = (NC // B,)

    x_flat = x.reshape(NC, H, W)  # free reshape, no padding pass in the wrapper

    kernel = functools.partial(_blur_kernel, w1d=w1d, pad=pad, H=H, W=W)

    itemsize = jnp.dtype(x.dtype).itemsize
    cost = pl.CostEstimate(
        flops=2 * 2 * size * H * W * NC,          # mul+add per tap, 2K taps per pixel
        transcendentals=0,
        bytes_accessed=2 * NC * H * W * itemsize,  # one read + one write of the image
    )

    out_flat = pl.pallas_call(
        kernel,
        out_shape=jax.ShapeDtypeStruct((NC, H, W), x.dtype),
        grid_spec=pltpu.PrefetchScalarGridSpec(
            num_scalar_prefetch=0,
            grid=grid,
            in_specs=[
                # B channels per grid step; spatial block == full array dims.
                pl.BlockSpec((B, H, W), lambda n: (n, 0, 0)),
            ],
            out_specs=pl.BlockSpec((B, H, W), lambda n: (n, 0, 0)),
            scratch_shapes=[
                pltpu.VMEM((B, Hp, Wp), jnp.float32),  # single zero-padded staging buffer
            ],
        ),
        compiler_params=pltpu.CompilerParams(
            dimension_semantics=("parallel",),
        ),
        cost_estimate=cost,
    )(x_flat)

    return out_flat.reshape(N, C, H, W)


def _reference_blur(x, size, sigma):
    """Pure-JAX reference (depthwise cross-correlation with the 2D kernel, zero padding)."""
    w = _create_gaussian_kernel_2d(size, sigma)
    pad = size // 2
    C = x.shape[1]
    kern = jnp.tile(w[None, None, :, :], (C, 1, 1, 1))  # (C, 1, K, K)
    return jax.lax.conv_general_dilated(
        x, kern,
        window_strides=(1, 1),
        padding=((pad, pad), (pad, pad)),
        dimension_numbers=("NCHW", "OIHW", "NCHW"),
        feature_group_count=C,
    )


if __name__ == "__main__":
    key = jax.random.PRNGKey(0)
    N, C, H, W = 2, 4, 16, 16
    size, sigma = 5, 1.0

    x = jax.random.normal(key, (N, C, H, W), dtype=jnp.float32)

    out = gaussian_blur(x, size=size, sigma=sigma)
    out = jax.block_until_ready(out)

    ref = jax.block_until_ready(_reference_blur(x, size, sigma))
    assert out.shape == (N, C, H, W)
    np.testing.assert_allclose(np.asarray(out), np.asarray(ref), atol=1e-5, rtol=1e-5)

    print("KERNEL_OK")
</pallas_src>

<mosaic_0001>
module attributes {stable_mosaic.version = 11 : i64} {
  func.func @_blur_kernel(%arg0: i32, %arg1: memref<4x16x16xf32, #tpu.memory_space<vmem>>, %arg2: memref<4x16x16xf32, #tpu.memory_space<vmem>>, %arg3: memref<4x20x20xf32, #tpu.memory_space<vmem>>) attributes {dimension_semantics = [#tpu.dimension_semantics<parallel>], iteration_bounds = array<i64: 2>, scalar_prefetch = 0 : i64, scratch_operands = 1 : i64, tpu.core_type = #tpu.core_type<tc>, window_params = [{transform_indices = @transform_0, window_bounds = array<i64: 4, 16, 16>}, {transform_indices = @transform_1, window_bounds = array<i64: 4, 16, 16>}]} {
    %cst = arith.constant 0.000000e+00 : f32
    %0 = vector.broadcast %cst : f32 to vector<4x16x2xf32>
    %c0 = arith.constant 0 : index
    %c2 = arith.constant 2 : index
    %c0_0 = arith.constant 0 : index
    %1 = vector.load %arg3[%c0, %c2, %c0_0] : memref<4x20x20xf32, #tpu.memory_space<vmem>>, vector<4x16x2xf32>
    tpu.vector_store %arg3[%c0, %c2, %c0_0], %0 {strides = array<i32>} : memref<4x20x20xf32, #tpu.memory_space<vmem>>, vector<4x16x2xf32>,
    %c0_1 = arith.constant 0 : index
    %c2_2 = arith.constant 2 : index
    %c18 = arith.constant 18 : index
    %2 = vector.load %arg3[%c0_1, %c2_2, %c18] : memref<4x20x20xf32, #tpu.memory_space<vmem>>, vector<4x16x2xf32>
    tpu.vector_store %arg3[%c0_1, %c2_2, %c18], %0 {strides = array<i32>} : memref<4x20x20xf32, #tpu.memory_space<vmem>>, vector<4x16x2xf32>,
    %cst_3 = arith.constant 0.000000e+00 : f32
    %3 = vector.broadcast %cst_3 : f32 to vector<4x2x16xf32>
    %c0_4 = arith.constant 0 : index
    %c0_5 = arith.constant 0 : index
    %c2_6 = arith.constant 2 : index
    %4 = vector.load %arg3[%c0_4, %c0_5, %c2_6] : memref<4x20x20xf32, #tpu.memory_space<vmem>>, vector<4x2x16xf32>
    tpu.vector_store %arg3[%c0_4, %c0_5, %c2_6], %3 {strides = array<i32>} : memref<4x20x20xf32, #tpu.memory_space<vmem>>, vector<4x2x16xf32>,
    %c0_7 = arith.constant 0 : index
    %c18_8 = arith.constant 18 : index
    %c2_9 = arith.constant 2 : index
    %5 = vector.load %arg3[%c0_7, %c18_8, %c2_9] : memref<4x20x20xf32, #tpu.memory_space<vmem>>, vector<4x2x16xf32>
    tpu.vector_store %arg3[%c0_7, %c18_8, %c2_9], %3 {strides = array<i32>} : memref<4x20x20xf32, #tpu.memory_space<vmem>>, vector<4x2x16xf32>,
    %c0_10 = arith.constant 0 : index
    %c0_11 = arith.constant 0 : index
    %c0_12 = arith.constant 0 : index
    %6 = vector.load %arg1[%c0_10, %c0_11, %c0_12] : memref<4x16x16xf32, #tpu.memory_space<vmem>>, vector<4x16x16xf32>
    %c0_13 = arith.constant 0 : index
    %c2_14 = arith.constant 2 : index
    %c2_15 = arith.constant 2 : index
    %7 = vector.load %arg3[%c0_13, %c2_14, %c2_15] : memref<4x20x20xf32, #tpu.memory_space<vmem>>, vector<4x16x16xf32>
    tpu.vector_store %arg3[%c0_13, %c2_14, %c2_15], %6 {strides = array<i32>} : memref<4x20x20xf32, #tpu.memory_space<vmem>>, vector<4x16x16xf32>,
    %c0_16 = arith.constant 0 : index
    %c2_17 = arith.constant 2 : index
    %c0_18 = arith.constant 0 : index
    %8 = vector.load %arg3[%c0_16, %c2_17, %c0_18] : memref<4x20x20xf32, #tpu.memory_space<vmem>>, vector<4x16x16xf32>
    %cst_19 = arith.constant 0.054488685 : f32
    %9 = vector.broadcast %cst_19 : f32 to vector<4x16x16xf32>
    %10 = arith.mulf %9, %8 : vector<4x16x16xf32>
    %c0_20 = arith.constant 0 : index
    %c2_21 = arith.constant 2 : index
    %c1 = arith.constant 1 : index
    %11 = vector.load %arg3[%c0_20, %c2_21, %c1] : memref<4x20x20xf32, #tpu.memory_space<vmem>>, vector<4x16x16xf32>
    %cst_22 = arith.constant 0.244201347 : f32
    %12 = vector.broadcast %cst_22 : f32 to vector<4x16x16xf32>
    %13 = arith.mulf %12, %11 : vector<4x16x16xf32>
    %14 = arith.addf %10, %13 : vector<4x16x16xf32>
    %c0_23 = arith.constant 0 : index
    %c2_24 = arith.constant 2 : index
    %c2_25 = arith.constant 2 : index
    %15 = vector.load %arg3[%c0_23, %c2_24, %c2_25] : memref<4x20x20xf32, #tpu.memory_space<vmem>>, vector<4x16x16xf32>
    %cst_26 = arith.constant 0.402619958 : f32
    %16 = vector.broadcast %cst_26 : f32 to vector<4x16x16xf32>
    %17 = arith.mulf %16, %15 : vector<4x16x16xf32>
    %18 = arith.addf %14, %17 : vector<4x16x16xf32>
    %c0_27 = arith.constant 0 : index
    %c2_28 = arith.constant 2 : index
    %c3 = arith.constant 3 : index
    %19 = vector.load %arg3[%c0_27, %c2_28, %c3] : memref<4x20x20xf32, #tpu.memory_space<vmem>>, vector<4x16x16xf32>
    %cst_29 = arith.constant 0.244201347 : f32
    %20 = vector.broadcast %cst_29 : f32 to vector<4x16x16xf32>
    %21 = arith.mulf %20, %19 : vector<4x16x16xf32>
    %22 = arith.addf %18, %21 : vector<4x16x16xf32>
    %c0_30 = arith.constant 0 : index
    %c2_31 = arith.constant 2 : index
    %c4 = arith.constant 4 : index
    %23 = vector.load %arg3[%c0_30, %c2_31, %c4] : memref<4x20x20xf32, #tpu.memory_space<vmem>>, vector<4x16x16xf32>
    %cst_32 = arith.constant 0.054488685 : f32
    %24 = vector.broadcast %cst_32 : f32 to vector<4x16x16xf32>
    %25 = arith.mulf %24, %23 : vector<4x16x16xf32>
    %26 = arith.addf %22, %25 : vector<4x16x16xf32>
    %c0_33 = arith.constant 0 : index
    %c2_34 = arith.constant 2 : index
    %c2_35 = arith.constant 2 : index
    %27 = vector.load %arg3[%c0_33, %c2_34, %c2_35] : memref<4x20x20xf32, #tpu.memory_space<vmem>>, vector<4x16x16xf32>
    tpu.vector_store %arg3[%c0_33, %c2_34, %c2_35], %26 {strides = array<i32>} : memref<4x20x20xf32, #tpu.memory_space<vmem>>, vector<4x16x16xf32>,
    %c0_36 = arith.constant 0 : index
    %c0_37 = arith.constant 0 : index
    %c2_38 = arith.constant 2 : index
    %28 = vector.load %arg3[%c0_36, %c0_37, %c2_38] : memref<4x20x20xf32, #tpu.memory_space<vmem>>, vector<4x16x16xf32>
    %cst_39 = arith.constant 0.054488685 : f32
    %29 = vector.broadcast %cst_39 : f32 to vector<4x16x16xf32>
    %30 = arith.mulf %29, %28 : vector<4x16x16xf32>
    %c0_40 = arith.constant 0 : index
    %c1_41 = arith.constant 1 : index
    %c2_42 = arith.constant 2 : index
    %31 = vector.load %arg3[%c0_40, %c1_41, %c2_42] : memref<4x20x20xf32, #tpu.memory_space<vmem>>, vector<4x16x16xf32>
    %cst_43 = arith.constant 0.244201347 : f32
    %32 = vector.broadcast %cst_43 : f32 to vector<4x16x16xf32>
    %33 = arith.mulf %32, %31 : vector<4x16x16xf32>
    %34 = arith.addf %30, %33 : vector<4x16x16xf32>
    %c0_44 = arith.constant 0 : index
    %c2_45 = arith.constant 2 : index
    %c2_46 = arith.constant 2 : index
    %35 = vector.load %arg3[%c0_44, %c2_45, %c2_46] : memref<4x20x20xf32, #tpu.memory_space<vmem>>, vector<4x16x16xf32>
    %cst_47 = arith.constant 0.402619958 : f32
    %36 = vector.broadcast %cst_47 : f32 to vector<4x16x16xf32>
    %37 = arith.mulf %36, %35 : vector<4x16x16xf32>
    %38 = arith.addf %34, %37 : vector<4x16x16xf32>
    %c0_48 = arith.constant 0 : index
    %c3_49 = arith.constant 3 : index
    %c2_50 = arith.constant 2 : index
    %39 = vector.load %arg3[%c0_48, %c3_49, %c2_50] : memref<4x20x20xf32, #tpu.memory_space<vmem>>, vector<4x16x16xf32>
    %cst_51 = arith.constant 0.244201347 : f32
    %40 = vector.broadcast %cst_51 : f32 to vector<4x16x16xf32>
    %41 = arith.mulf %40, %39 : vector<4x16x16xf32>
    %42 = arith.addf %38, %41 : vector<4x16x16xf32>
    %c0_52 = arith.constant 0 : index
    %c4_53 = arith.constant 4 : index
    %c2_54 = arith.constant 2 : index
    %43 = vector.load %arg3[%c0_52, %c4_53, %c2_54] : memref<4x20x20xf32, #tpu.memory_space<vmem>>, vector<4x16x16xf32>
    %cst_55 = arith.constant 0.054488685 : f32
    %44 = vector.broadcast %cst_55 : f32 to vector<4x16x16xf32>
    %45 = arith.mulf %44, %43 : vector<4x16x16xf32>
    %46 = arith.addf %42, %45 : vector<4x16x16xf32>
    %c0_56 = arith.constant 0 : index
    %c0_57 = arith.constant 0 : index
    %c0_58 = arith.constant 0 : index
    %47 = vector.load %arg2[%c0_56, %c0_57, %c0_58] : memref<4x16x16xf32, #tpu.memory_space<vmem>>, vector<4x16x16xf32>
    tpu.vector_store %arg2[%c0_56, %c0_57, %c0_58], %46 {strides = array<i32>} : memref<4x16x16xf32, #tpu.memory_space<vmem>>, vector<4x16x16xf32>,
    return
  }
  func.func @transform_0(%arg0: i32) -> (i32, i32, i32) {
    %c0_i32 = arith.constant 0 : i32
    %c0_i32_0 = arith.constant 0 : i32
    %c0_i32_1 = arith.constant 0 : i32
    return %arg0, %c0_i32, %c0_i32_0 : i32, i32, i32
  }
  func.func @transform_1(%arg0: i32) -> (i32, i32, i32) {
    %c0_i32 = arith.constant 0 : i32
    %c0_i32_0 = arith.constant 0 : i32
    %c0_i32_1 = arith.constant 0 : i32
    return %arg0, %c0_i32, %c0_i32_0 : i32, i32, i32
  }
}

</mosaic_0001>

<bundles_post_ra>
// kernel: tpu_custom_call.1
= control target key start
LH: loop header
LB: loop body
LE: loop exit
PB: predicated region body
PF: predicated region fallthrough
CT: control target
= control target key end

     0   :  { %6 = vsyncpa [#allocation4], 0  ;;  %s1130_s0 = inlined_call_operand.hbm [shape: f32[8,16,16], index: 0, kind: input, shape index: {}]   ;;  %s1131_s1 = inlined_call_operand.hbm [shape: f32[8,16,16], index: 1, kind: output, shape index: {}]  }
   0x1   :  { %8 = vsyncpa [#allocation4 + $0x1], 0 }
   0x2   :  { %9 = vsyncpa [#allocation5], 0 }
   0x3   :  { %11 = vsyncpa [#allocation5 + $0x1], 0  ;;  %s877_s6 = smov 0   ;;  %s879_s7 = smov 0  }
   0x4   :  { %s881_s8 = smov 0   ;;  %s883_s9 = smov 0  }
   0x5 LB: > { %s898_s10 = sadd.s32 4294967295, %s855_s9   ;;  %s683_s11 = sadd.s32 4294967294, %s855_s9   ;;  %s855_s9 = sphi %s883_s9, %s1141_s9   ;;  %s851_s8 = sphi %s881_s8, %s1140_s8   ;;  %s847_s7 = sphi %s879_s7, %s1139_s7   ;;  %s843_s6 = sphi %s877_s6, %s1138_s6  }
   0x6   : > { %s902_s12 = sadd.s32 1, %s855_s9   ;;  %s24_s13 = sadd.s32 1, %s851_s8 }
   0x7   : > { %s21_s14 = ssub.s32 %s855_s9, %s902_s12  ;;  %p31_p0 = scmp.ne.s32.totalorder %s851_s8, %s847_s7 }
   0x8   : > { %p22_p1 = scmp.eq.s32.totalorder %s21_s14, 0  ;;  %p32_p2 = scmp.eq.s32.totalorder %s855_s9, 0 }
   0x9   : > { %p37_p3 = scmp.ne.s32.totalorder %s847_s7, %s843_s6  ;;  %p38_p4 = scmp.eq.s32.totalorder %s898_s10, 0 }
   0xa   : > { %s914_s15 = scalar_select %p22_p1, %s851_s8, %s24_s13  }
   0xb   : > { %p916_p5 = por %p32_p2, %p31_p0  ;;  %p920_p6 = por %p38_p4, %p37_p3 }
   0xc   : > { %p61_p7 = scmp.eq.s32.totalorder %s898_s10, 1  ;;  %p67_p8 = scmp.eq.s32.totalorder %s683_s11, 1 }
   0xd   : > { %p715_p10 = scmp.lt.s32.totalorder %s855_s9, 2  ;;  %s87_s20 = sand.u32 1, %s851_s8  }
   0xe   : > { %p927_p11 = por %p61_p7, %p31_p0  ;;  %p931_p12 = por %p67_p8, %p37_p3 }
   0xf   : > { %s700_s21 = sshll.u32 %s855_s9, 6  ;;  %s686_s22 = sshll.u32 %s87_s20, 6 }
  0x10   : > { %s97_s25 = scalar_lea.hbm %s1130_s0, %s700_s21  ;;  %s91_s27 = scalar_lea.vmem [#allocation3], %s686_s22 }
  0x11   : > { %s98_s26 = sshll.u32 %s97_s25, 4  ;;  %s100_s28 = sshll.u32 %s91_s27, 4  ;;  %s99_s26 = int_to_ptr.hbm [resolvable:$true] %s98_s26  ;;  %s101_s28 = int_to_ptr.vmem [resolvable:$true] %s100_s28 }
  0x12   : > { %p942_p13 = pnand %p715_p10, %p916_p5  ;;  %p690_p0 = scmp.ge.s32.totalorder %s855_s9, 1 }
  0x13   : > { %p108_p1 = scmp.lt.s32.totalorder %s855_s9, 3  ;;  %s88_s30 = scalar_lea.sflag [#allocation4], %s87_s20 }
  0x14   : > { %s759_s2 = sshra.s32 %s99_s26, 4  ;;  %p763_p3 = pneg %p942_p13  ;;  %s760_s2 = int_to_ptr.hbm [resolvable:$true] %s759_s2 }
  0x15   : > { %s761_s3 = scalar_lea.hbm %s760_s2, 64  ;;  %s766_s11 = scalar_lea.hbm %s1130_s0, 128 }
  0x16   : > { %p762_p2 = scmp.ne.s32.totalorder %s760_s2, %s761_s3  ;;  %p767_p5 = scmp.lt.s32.totalorder %s760_s2, %s1130_s0 }
  0x17   : > { %p768_p8 = scmp.lt.s32.totalorder %s766_s11, %s761_s3 }
  0x18   : > { %p764_p4 = pnand %p763_p3, %p762_p2 }
  0x19   : > { %p769_p10 = por %p768_p8, %p767_p5 }
  0x1a   : > { %p765_p7 = pneg %p764_p4 }
  0x1c   : > { %p770_p9 = pnand %p769_p10, %p765_p7 }
  0x1e   : > { %773 = shalt.err (!%p770_p9)
}
  0x1f   : > { %s857_s16 = smov 128   ;;  %s858_s20 = smov 8  }
  0x20   : > { %710 = dma.hbm_to_vmem [thread:$0]  (!%p942_p13), %s99_s26, 1024, %s101_s28, %s88_s30, %s857_s16, %s857_s16, %s858_s20  }
  0x21   : > { %p109_p2 = pnand %p690_p0, %p108_p1 }
  0x22   : > { %s963_s21 = sand.u32 (!%p109_p2), 1, %s847_s7  }
  0x23   : > { %112 = sbr.rel (%p109_p2) target bundleno = 614 (0x266), region = 24  ;;  %s691_s22 = sshll.u32 (!%p109_p2), %s963_s21, 6 }
  0x24   : > { %s115_s23 = scalar_lea.sflag (!%p109_p2), [#allocation4], %s963_s21  ;;  %s969_s24 = scalar_lea.vmem (!%p109_p2), [#allocation3], %s691_s22 }
  0x28   : > { %834 = dma.done.wait (%p920_p6), %s115_s23, 1024  }
  0x29   : > { %836 = vsyncadd (%p920_p6), %s115_s23, 4294966272  ;;  %vm140_vm0 = vcmask 15360   ;;  %vm149_vm1 = vcmask 162960   ;;  %v859_v0 = vmov 0.0   ;;  %v169_v1 = vld [vmem:[%s969_s24 + $0x10] sm:$0xff]  ;;  %v167_v2 = vld [vmem:[%s969_s24] sm:$0xff] }
  0x2a   : > { %145 = vst.msk [vmem:[#allocation2 + $0x32] sm:$0xff] %vm140_vm0, %v859_v0  ;;  %s860_s17 = smov 2   ;;  %v171_v3 = vld [vmem:[%s969_s24 + $0x20] sm:$0xff]  ;;  %v170_v4 = vld [vmem:[%s969_s24 + $0x18] sm:$0xff]  ;;  %v168_v5 = vld [vmem:[%s969_s24 + $0x8] sm:$0xff]  ;;  %vm207_vm2 = vcmask 146448  }
  0x2b   : > { %154 = vst.msk [vmem:[#allocation2 + $0x32] sm:$0xff] %vm149_vm1, %v859_v0  ;;  %187 = vrot.lane.b32.xlu1 %v169_v1, %s860_s17  ;;  %183 = vrot.lane.b32.xlu0 %v167_v2, %s860_s17  ;;  %v172_v6 = vld [vmem:[%s969_s24 + $0x28] sm:$0xff]  ;;  %v173_v7 = vld [vmem:[%s969_s24 + $0x30] sm:$0xff]  ;;  %s861_s25 = smov 127   ;;  %s862_s26 = smov 126   ;;  %vm158_vm3 = vcmask 140304  }
  0x2c   : > { %141 = vst.msk [vmem:[#allocation2 + $0x2] sm:$0xff] %vm140_vm0, %v859_v0  ;;  %191 = vrot.lane.b32.xlu2 %v171_v3, %s860_s17  ;;  %v174_v8 = vld [vmem:[%s969_s24 + $0x38] sm:$0xff]  ;;  %s863_s27 = smov 125   ;;  %s864_s28 = smov 124   ;;  %vm584_vm4 = vcmask 130048  }
  0x2d   : > { %142 = vst.msk [vmem:[#allocation2 + $0xa] sm:$0xff] %vm140_vm0, %v859_v0  ;;  %s137_s29 = scalar_lea.vmem [#allocation6], %s691_s22  ;;  %s702_s30 = sshll.u32 %s898_s10, 6 }
  0x2e   : > { %143 = vst.msk [vmem:[#allocation2 + $0x1a] sm:$0xff] %vm140_vm0, %v859_v0  ;;  %s606_s4 = scalar_lea.hbm %s1131_s1, %s702_s30  ;;  %s607_s5 = sshll.u32 %s137_s29, 4  ;;  %s608_s5 = int_to_ptr.vmem [resolvable:$true] %s607_s5 }
  0x2f   : > { %144 = vst.msk [vmem:[#allocation2 + $0x22] sm:$0xff] %vm140_vm0, %v859_v0  ;;  %s609_s11 = sshll.u32 %s606_s4, 4  ;;  %s594_s10 = scalar_lea.sflag [#allocation5], %s963_s21  ;;  %s610_s11 = int_to_ptr.hbm [resolvable:$true] %s609_s11 }
  0x30   : > { %146 = vst.msk [vmem:[#allocation2 + $0x3a] sm:$0xff] %vm140_vm0, %v859_v0  ;;  %s803_s13 = sshra.s32 %s610_s11, 4  ;;  %s809_s22 = scalar_lea.hbm %s1131_s1, 128  ;;  %s804_s13 = int_to_ptr.hbm [resolvable:$true] %s803_s13 }
  0x31   : > { %147 = vst.msk [vmem:[#allocation2 + $0x4a] sm:$0xff] %vm140_vm0, %v859_v0  ;;  %s805_s14 = scalar_lea.hbm %s804_s13, 64  ;;  %p810_p0 = scmp.lt.s32.totalorder %s804_s13, %s1131_s1 }
  0x32   : > { %148 = vst.msk [vmem:[#allocation2 + $0x52] sm:$0xff] %vm140_vm0, %v859_v0  ;;  %p806_p6 = scmp.ne.s32.totalorder %s804_s13, %s805_s14  ;;  %p811_p1 = scmp.lt.s32.totalorder %s809_s22, %s805_s14 }
  0x33   : > { %152 = vst.msk [vmem:[#allocation2 + $0x1a] sm:$0xff] %vm149_vm1, %v859_v0  ;;  %189 = vrot.lane.b32.xlu1 %v170_v4, %s860_s17  ;;  %185 = vrot.lane.b32.xlu0 %v168_v5, %s860_s17 }
  0x34   : > { %150 = vst.msk [vmem:[#allocation2 + $0x2] sm:$0xff] %vm149_vm1, %v859_v0  ;;  %193 = vrot.lane.b32.xlu2 %v172_v6, %s860_s17  ;;  %p807_p9 = pnand %p806_p6, %p927_p11  ;;  %p812_p3 = por %p811_p1, %p810_p0 }
  0x35   : > { %151 = vst.msk [vmem:[#allocation2 + $0xa] sm:$0xff] %vm149_vm1, %v859_v0 }
  0x36   : > { %153 = vst.msk [vmem:[#allocation2 + $0x22] sm:$0xff] %vm149_vm1, %v859_v0  ;;  %p808_p13 = pneg %p807_p9 }
  0x37   : > { %155 = vst.msk [vmem:[#allocation2 + $0x3a] sm:$0xff] %vm149_vm1, %v859_v0 }
  0x38   : > { %156 = vst.msk [vmem:[#allocation2 + $0x4a] sm:$0xff] %vm149_vm1, %v859_v0  ;;  %p813_p4 = pnand %p812_p3, %p808_p13 }
  0x39   : > { %157 = vst.msk [vmem:[#allocation2 + $0x52] sm:$0xff] %vm149_vm1, %v859_v0 }
  0x3a   : > { %163 = vst.msk [vmem:[#allocation2 + $0x12] sm:$0x3] %vm158_vm3, %v859_v0 }
  0x3b   : > { %195 = vrot.lane.b32.xlu0 %v173_v7, %s860_s17  ;;  %197 = vrot.lane.b32.xlu1 %v174_v8, %s860_s17  ;;  %159 = vst.msk [vmem:[#allocation2] sm:$0x3] %vm158_vm3, %v859_v0 }
  0x3c   : > { %160 = vst.msk [vmem:[#allocation2 + $0x18] sm:$0x3] %vm158_vm3, %v859_v0 }
  0x3d   : > { %161 = vst.msk [vmem:[#allocation2 + $0x30] sm:$0x3] %vm158_vm3, %v859_v0 }
  0x3e   : > { %162 = vst.msk [vmem:[#allocation2 + $0x48] sm:$0x3] %vm158_vm3, %v859_v0 }
  0x3f   : > { %164 = vst.msk [vmem:[#allocation2 + $0x2a] sm:$0x3] %vm158_vm3, %v859_v0 }
  0x40   : > { %165 = vst.msk [vmem:[#allocation2 + $0x42] sm:$0x3] %vm158_vm3, %v859_v0 }
  0x41   : > { %166 = vst.msk [vmem:[#allocation2 + $0x5a] sm:$0x3] %vm158_vm3, %v859_v0 }
  0x86   : > { %v192_v9 = vpop.permute.xlu2 %191 }
  0x87   : > { %212 = vst.msk [vmem:[#allocation2 + $0x32] sm:$0xff] %vm207_vm2, %v192_v9 }
  0x8e   : > { %v194_v10 = vpop.permute.xlu2 %193  ;;  %v220_v27 = vld [vmem:[#allocation2 + $0x32] sm:$0xff] }
  0x8f   : > { %213 = vst.msk [vmem:[#allocation2 + $0x3a] sm:$0xff] %vm207_vm2, %v194_v10  ;;  %v236_v31 = vmul.f32 0.24420135, %v220_v27  ;;  %v284_v38 = vmul.f32 0.40261996, %v220_v27 }
  0x90   : > { %v1047_v46 = vmul.f32 0.054488685, %v220_v27 }
  0x96   : > { %v221_v19 = vld [vmem:[#allocation2 + $0x3a] sm:$0xff] }
  0x97   : > { %v237_v20 = vmul.f32 0.24420135, %v221_v19  ;;  %v285_v39 = vmul.f32 0.40261996, %v221_v19  ;;  %v229_v43 = vmul.f32 0.054488685, %v221_v19 }
  0x9d   : > { %v188_v11 = vpop.permute.xlu1 %187  ;;  %v184_v12 = vpop.permute.xlu0 %183 }
  0x9e   : > { %210 = vst.msk [vmem:[#allocation2 + $0x1a] sm:$0xff] %vm207_vm2, %v188_v11 }
  0x9f   : > { %208 = vst.msk [vmem:[#allocation2 + $0x2] sm:$0xff] %vm207_vm2, %v184_v12 }
  0xa5   : > { %v190_v13 = vpop.permute.xlu1 %189  ;;  %v186_v14 = vpop.permute.xlu0 %185  ;;  %v218_v15 = vld [vmem:[#allocation2 + $0x1a] sm:$0xff] }
  0xa6   : > { %211 = vst.msk [vmem:[#allocation2 + $0x22] sm:$0xff] %vm207_vm2, %v190_v13  ;;  %v234_v16 = vmul.f32 0.24420135, %v218_v15  ;;  %v216_v17 = vld [vmem:[#allocation2 + $0x2] sm:$0xff]  ;;  %v282_v37 = vmul.f32 0.40261996, %v218_v15 }
  0xa7   : > { %209 = vst.msk [vmem:[#allocation2 + $0xa] sm:$0xff] %vm207_vm2, %v186_v14  ;;  %v232_v18 = vmul.f32 0.24420135, %v216_v17  ;;  %v280_v29 = vmul.f32 0.40261996, %v216_v17 }
  0xa8   : > { %252 = vrot.lane.b32.xlu1 %v234_v16, %s861_s25  ;;  %v226_v41 = vmul.f32 0.054488685, %v218_v15  ;;  %v224_v42 = vmul.f32 0.054488685, %v216_v17 }
  0xa9   : > { %248 = vrot.lane.b32.xlu2 %v232_v18, %s861_s25 }
  0xad   : > { %v196_v21 = vpop.permute.xlu0 %195  ;;  %v219_v22 = vld [vmem:[#allocation2 + $0x22] sm:$0xff]  ;;  %v198_v23 = vpop.permute.xlu1 %197 }
  0xae   : > { %214 = vst.msk [vmem:[#allocation2 + $0x4a] sm:$0xff] %vm207_vm2, %v196_v21  ;;  %v217_v24 = vld [vmem:[#allocation2 + $0xa] sm:$0xff]  ;;  %v235_v25 = vmul.f32 0.24420135, %v219_v22  ;;  %v283_v33 = vmul.f32 0.40261996, %v219_v22 }
  0xaf   : > { %v233_v26 = vmul.f32 0.24420135, %v217_v24  ;;  %215 = vst.msk [vmem:[#allocation2 + $0x52] sm:$0xff] %vm207_vm2, %v198_v23  ;;  %v281_v35 = vmul.f32 0.40261996, %v217_v24 }
  0xb0   : > { %258 = vrot.lane.b32.xlu1 %v237_v20, %s861_s25  ;;  %v225_v44 = vmul.f32 0.054488685, %v217_v24  ;;  %v227_v45 = vmul.f32 0.054488685, %v219_v22 }
  0xb1   : > { %250 = vrot.lane.b32.xlu0 %v233_v26, %s861_s25  ;;  %254 = vrot.lane.b32.xlu2 %v235_v25, %s861_s25 }
  0xb5   : > { %v222_v28 = vld [vmem:[#allocation2 + $0x4a] sm:$0xff] }
  0xb6   : > { %v238_v30 = vmul.f32 0.24420135, %v222_v28  ;;  %v223_v32 = vld [vmem:[#allocation2 + $0x52] sm:$0xff]  ;;  %v286_v36 = vmul.f32 0.40261996, %v222_v28 }
  0xb7   : > { %v239_v34 = vmul.f32 0.24420135, %v223_v32  ;;  %v287_v40 = vmul.f32 0.40261996, %v223_v32  ;;  %v230_v47 = vmul.f32 0.054488685, %v222_v28 }
  0xb8   : > { %296 = vrot.lane.b32.xlu1 %v280_v29, %s862_s26  ;;  %v1050_v48 = vmul.f32 0.054488685, %v223_v32 }
  0xb9   : > { %256 = vrot.lane.b32.xlu0 %v236_v31, %s861_s25  ;;  %260 = vrot.lane.b32.xlu2 %v238_v30, %s861_s25 }
  0xc0   : > { %302 = vrot.lane.b32.xlu1 %v283_v33, %s862_s26 }
  0xc1   : > { %262 = vrot.lane.b32.xlu0 %v239_v34, %s861_s25  ;;  %298 = vrot.lane.b32.xlu2 %v281_v35, %s862_s26 }
  0xc8   : > { %308 = vrot.lane.b32.xlu1 %v286_v36, %s862_s26 }
  0xc9   : > { %300 = vrot.lane.b32.xlu0 %v282_v37, %s862_s26  ;;  %304 = vrot.lane.b32.xlu2 %v284_v38, %s862_s26 }
  0xd0   : > { %330 = vrot.lane.b32.xlu1 %v233_v26, %s863_s27 }
  0xd1   : > { %306 = vrot.lane.b32.xlu0 %v285_v39, %s862_s26  ;;  %310 = vrot.lane.b32.xlu2 %v287_v40, %s862_s26 }
  0xd8   : > { %336 = vrot.lane.b32.xlu1 %v236_v31, %s863_s27 }
  0xd9   : > { %328 = vrot.lane.b32.xlu0 %v232_v18, %s863_s27  ;;  %332 = vrot.lane.b32.xlu2 %v234_v16, %s863_s27 }
  0xe0   : > { %342 = vrot.lane.b32.xlu1 %v239_v34, %s863_s27 }
  0xe1   : > { %334 = vrot.lane.b32.xlu0 %v235_v25, %s863_s27  ;;  %338 = vrot.lane.b32.xlu2 %v237_v20, %s863_s27 }
  0xe8   : > { %372 = vrot.lane.b32.xlu1 %v226_v41, %s864_s28 }
  0xe9   : > { %340 = vrot.lane.b32.xlu0 %v238_v30, %s863_s27  ;;  %368 = vrot.lane.b32.xlu2 %v224_v42, %s864_s28 }
  0xf0   : > { %378 = vrot.lane.b32.xlu1 %v229_v43, %s864_s28 }
  0xf1   : > { %370 = vrot.lane.b32.xlu0 %v225_v44, %s864_s28  ;;  %374 = vrot.lane.b32.xlu2 %v227_v45, %s864_s28 }
  0xf9   : > { %376 = vrot.lane.b32.xlu0 %v1047_v46, %s864_s28  ;;  %380 = vrot.lane.b32.xlu2 %v230_v47, %s864_s28 }
 0x101   : > { %382 = vrot.lane.b32.xlu0 %v1050_v48, %s864_s28 }
 0x103   : > { %v249_v49 = vpop.permute.xlu2 %248 }
 0x104   : > { %v272_v5 = vadd.f32 %v249_v49, %v224_v42 }
 0x10b   : > { %v255_v50 = vpop.permute.xlu2 %254 }
 0x10c   : > { %v275_v12 = vadd.f32 %v255_v50, %v227_v45 }
 0x113   : > { %v261_v51 = vpop.permute.xlu2 %260 }
 0x114   : > { %v278_v21 = vadd.f32 %v261_v51, %v230_v47 }
 0x11a   : > { %v253_v52 = vpop.permute.xlu1 %252 }
 0x11b   : > { %v299_v53 = vpop.permute.xlu2 %298  ;;  %v274_v15 = vadd.f32 %v253_v52, %v226_v41 }
 0x122   : > { %v259_v54 = vpop.permute.xlu1 %258 }
 0x123   : > { %v251_v55 = vpop.permute.xlu0 %250  ;;  %v305_v56 = vpop.permute.xlu2 %304  ;;  %v277_v25 = vadd.f32 %v259_v54, %v229_v43 }
 0x124   : > { %v273_v28 = vadd.f32 %v251_v55, %v225_v44 }
 0x126   : > { %v321_v33 = vadd.f32 %v299_v53, %v273_v28 }
 0x12a   : > { %v297_v57 = vpop.permute.xlu1 %296 }
 0x12b   : > { %v257_v58 = vpop.permute.xlu0 %256  ;;  %v311_v59 = vpop.permute.xlu2 %310  ;;  %v320_v7 = vadd.f32 %v297_v57, %v272_v5 }
 0x12c   : > { %v276_v39 = vadd.f32 %v257_v58, %v1047_v46 }
 0x12e   : > { %v324_v41 = vadd.f32 %v305_v56, %v276_v39 }
 0x132   : > { %v303_v60 = vpop.permute.xlu1 %302 }
 0x133   : > { %v263_v61 = vpop.permute.xlu0 %262  ;;  %v333_v62 = vpop.permute.xlu2 %332  ;;  %v323_v13 = vadd.f32 %v303_v60, %v275_v12 }
 0x134   : > { %v279_v44 = vadd.f32 %v263_v61, %v1050_v48 }
 0x136   : > { %v327_v47 = vadd.f32 %v311_v59, %v279_v44 }
 0x13a   : > { %v309_v63 = vpop.permute.xlu1 %308 }
 0x13b   : > { %v301_v1 = vpop.permute.xlu0 %300  ;;  %v339_v2 = vpop.permute.xlu2 %338  ;;  %v326_v23 = vadd.f32 %v309_v63, %v278_v21 }
 0x13c   : > { %v322_v19 = vadd.f32 %v301_v1, %v274_v15 }
 0x13e   : > { %v354_v22 = vadd.f32 %v333_v62, %v322_v19 }
 0x142   : > { %v331_v3 = vpop.permute.xlu1 %330 }
 0x143   : > { %v307_v4 = vpop.permute.xlu0 %306  ;;  %v369_v6 = vpop.permute.xlu2 %368  ;;  %v353_v35 = vadd.f32 %v331_v3, %v321_v33 }
 0x144   : > { %v325_v30 = vadd.f32 %v307_v4, %v277_v25 }
 0x146   : > { %v357_v34 = vadd.f32 %v339_v2, %v325_v30 }
 0x14a   : > { %v337_v8 = vpop.permute.xlu1 %336 }
 0x14b   : > { %v329_v9 = vpop.permute.xlu0 %328  ;;  %v375_v16 = vpop.permute.xlu2 %374  ;;  %v356_v42 = vadd.f32 %v337_v8, %v324_v41 }
 0x14c   : > { %v352_v10 = vadd.f32 %v329_v9, %v320_v7 }
 0x14e   : > { %v392_v11 = vadd.f32 %v369_v6, %v352_v10 }
 0x150   : > { %408 = vrot.lane.b32.xlu1 %v392_v11, %s860_s17 }
 0x152   : > { %v343_v14 = vpop.permute.xlu1 %342 }
 0x153   : > { %v335_v17 = vpop.permute.xlu0 %334  ;;  %v381_v31 = vpop.permute.xlu2 %380  ;;  %v359_v49 = vadd.f32 %v343_v14, %v327_v47 }
 0x154   : > { %v355_v18 = vadd.f32 %v335_v17, %v323_v13 }
 0x156   : > { %v395_v20 = vadd.f32 %v375_v16, %v355_v18 }
 0x158   : > { %414 = vrot.lane.b32.xlu1 %v395_v20, %s860_s17 }
 0x15a   : > { %v373_v24 = vpop.permute.xlu1 %372 }
 0x15b   : > { %v394_v26 = vadd.f32 %v373_v24, %v354_v22  ;;  %v341_v27 = vpop.permute.xlu0 %340 }
 0x15c   : > { %v358_v29 = vadd.f32 %v341_v27, %v326_v23 }
 0x15d   : > { %412 = vrot.lane.b32.xlu0 %v394_v26, %s860_s17 }
 0x15e   : > { %v398_v32 = vadd.f32 %v381_v31, %v358_v29 }
 0x160   : > { %420 = vrot.lane.b32.xlu1 %v398_v32, %s860_s17 }
 0x162   : > { %v379_v36 = vpop.permute.xlu1 %378 }
 0x163   : > { %v397_v37 = vadd.f32 %v379_v36, %v357_v34  ;;  %v371_v38 = vpop.permute.xlu0 %370 }
 0x164   : > { %v393_v40 = vadd.f32 %v371_v38, %v353_v35 }
 0x165   : > { %418 = vrot.lane.b32.xlu0 %v397_v37, %s860_s17 }
 0x166   : > { %410 = vrot.lane.b32.xlu2 %v393_v40, %s860_s17 }
 0x16b   : > { %v377_v43 = vpop.permute.xlu0 %376 }
 0x16c   : > { %v396_v45 = vadd.f32 %v377_v43, %v356_v42 }
 0x16e   : > { %416 = vrot.lane.b32.xlu2 %v396_v45, %s860_s17 }
 0x173   : > { %v383_v50 = vpop.permute.xlu0 %382 }
 0x174   : > { %v399_v51 = vadd.f32 %v383_v50, %v359_v49 }
 0x176   : > { %422 = vrot.lane.b32.xlu2 %v399_v51, %s860_s17 }
 0x1c0   : > { %v411_v46 = vpop.permute.xlu2 %410 }
 0x1c1   : > { %433 = vst.msk [vmem:[#allocation2 + $0xa] sm:$0xff] %vm207_vm2, %v411_v46 }
 0x1c2   : > { %v409_v48 = vpop.permute.xlu1 %408 }
 0x1c3   : > { %432 = vst.msk [vmem:[#allocation2 + $0x2] sm:$0xff] %vm207_vm2, %v409_v48 }
 0x1c8   : > { %v417_v52 = vpop.permute.xlu2 %416  ;;  %v481_v53 = vld [vmem:[#allocation2 + $0xa] sm:$0xff] }
 0x1c9   : > { %436 = vst.msk [vmem:[#allocation2 + $0x32] sm:$0xff] %vm207_vm2, %v417_v52  ;;  %v505_v0 = vld [vmem:[#allocation2 + $0xb] sm:$0xff]  ;;  %v489_v2 = vmul.f32 0.40261996, %v481_v53 }
 0x1ca   : > { %v415_v54 = vpop.permute.xlu1 %414  ;;  %v441_v55 = vld [vmem:[#allocation2 + $0x8] sm:$0xff]  ;;  %v440_v57 = vld [vmem:[#allocation2] sm:$0xff]  ;;  %v513_v9 = vmul.f32 0.24420135, %v505_v0 }
 0x1cb   : > { %v457_v56 = vld [vmem:[#allocation2 + $0x9] sm:$0xff]  ;;  %435 = vst.msk [vmem:[#allocation2 + $0x22] sm:$0xff] %vm207_vm2, %v415_v54  ;;  %v449_v58 = vmul.f32 0.054488685, %v441_v55  ;;  %v456_v60 = vld [vmem:[#allocation2 + $0x1] sm:$0xff] }
 0x1cc   : > { %v465_v59 = vmul.f32 0.24420135, %v457_v56  ;;  %v448_v61 = vmul.f32 0.054488685, %v440_v57  ;;  %v464_v62 = vmul.f32 0.24420135, %v456_v60 }
 0x1cd   : > { %v480_v63 = vld [vmem:[#allocation2 + $0x2] sm:$0xff]  ;;  %v529_v4 = vld [vmem:[#allocation2 + $0xc] sm:$0xff] }
 0x1ce   : > { %v473_v1 = vadd.f32 %v465_v59, %v449_v58  ;;  %v504_v3 = vld [vmem:[#allocation2 + $0x3] sm:$0xff]  ;;  %v472_v5 = vadd.f32 %v464_v62, %v448_v61  ;;  %v488_v6 = vmul.f32 0.40261996, %v480_v63  ;;  %v537_v15 = vmul.f32 0.054488685, %v529_v4 }
 0x1cf   : > { %v413_v7 = vpop.permute.xlu0 %412  ;;  %v528_v10 = vld [vmem:[#allocation2 + $0x4] sm:$0xff]  ;;  %v512_v13 = vmul.f32 0.24420135, %v504_v3 }
 0x1d0   : > { %v497_v8 = vadd.f32 %v489_v2, %v473_v1  ;;  %434 = vst.msk [vmem:[#allocation2 + $0x1a] sm:$0xff] %vm207_vm2, %v413_v7  ;;  %v423_v11 = vpop.permute.xlu2 %422  ;;  %v496_v12 = vadd.f32 %v488_v6, %v472_v5  ;;  %v536_v18 = vmul.f32 0.054488685, %v528_v10  ;;  %v444_v20 = vld [vmem:[#allocation2 + $0x30] sm:$0xff] }
 0x1d1   : > { %439 = vst.msk [vmem:[#allocation2 + $0x52] sm:$0xff] %vm207_vm2, %v423_v11  ;;  %v460_v21 = vld [vmem:[#allocation2 + $0x31] sm:$0xff]  ;;  %v452_v25 = vmul.f32 0.054488685, %v444_v20 }
 0x1d2   : > { %v521_v14 = vadd.f32 %v513_v9, %v497_v8  ;;  %v421_v16 = vpop.permute.xlu1 %420  ;;  %v520_v17 = vadd.f32 %v512_v13, %v496_v12  ;;  %v484_v23 = vld [vmem:[#allocation2 + $0x32] sm:$0xff]  ;;  %v483_v24 = vld [vmem:[#allocation2 + $0x22] sm:$0xff]  ;;  %v468_v26 = vmul.f32 0.24420135, %v460_v21 }
 0x1d3   : > { %438 = vst.msk [vmem:[#allocation2 + $0x4a] sm:$0xff] %vm207_vm2, %v421_v16  ;;  %v492_v31 = vmul.f32 0.40261996, %v484_v23  ;;  %v507_v34 = vld [vmem:[#allocation2 + $0x23] sm:$0xff]  ;;  %v491_v38 = vmul.f32 0.40261996, %v483_v24 }
 0x1d4   : > { %v545_v19 = vadd.f32 %v537_v15, %v521_v14  ;;  %v544_v22 = vadd.f32 %v536_v18, %v520_v17  ;;  %v531_v51 = vld [vmem:[#allocation2 + $0x24] sm:$0xff]  ;;  %v476_v46 = vadd.f32 %v468_v26, %v452_v25  ;;  %v515_v54 = vmul.f32 0.24420135, %v507_v34 }
 0x1d5   : > { %v539_v62 = vmul.f32 0.054488685, %v531_v51 }
 0x1d6   : > { %562 = vrot.lane.b32.xlu1 %v545_v19, %s862_s26  ;;  %560 = vrot.lane.b32.xlu0 %v544_v22, %s862_s26  ;;  %v500_v5 = vadd.f32 %v492_v31, %v476_v46 }
 0x1d7   : > { %v419_v27 = vpop.permute.xlu0 %418  ;;  %v442_v28 = vld [vmem:[#allocation2 + $0x18] sm:$0xff]  ;;  %v443_v37 = vld [vmem:[#allocation2 + $0x20] sm:$0xff] }
 0x1d8   : > { %v458_v29 = vld [vmem:[#allocation2 + $0x19] sm:$0xff]  ;;  %437 = vst.msk [vmem:[#allocation2 + $0x3a] sm:$0xff] %vm207_vm2, %v419_v27  ;;  %v450_v32 = vmul.f32 0.054488685, %v442_v28  ;;  %v451_v41 = vmul.f32 0.054488685, %v443_v37 }
 0x1d9   : > { %v482_v30 = vld [vmem:[#allocation2 + $0x1a] sm:$0xff]  ;;  %v466_v33 = vmul.f32 0.24420135, %v458_v29  ;;  %v487_v0 = vld [vmem:[#allocation2 + $0x52] sm:$0xff] }
 0x1da   : > { %v490_v35 = vmul.f32 0.40261996, %v482_v30  ;;  %v506_v36 = vld [vmem:[#allocation2 + $0x1b] sm:$0xff]  ;;  %v446_v43 = vld [vmem:[#allocation2 + $0x48] sm:$0xff]  ;;  %v447_v55 = vld [vmem:[#allocation2 + $0x50] sm:$0xff] }
 0x1db   : > { %v474_v39 = vadd.f32 %v466_v33, %v450_v32  ;;  %v530_v40 = vld [vmem:[#allocation2 + $0x1c] sm:$0xff]  ;;  %v454_v45 = vmul.f32 0.054488685, %v446_v43  ;;  %v462_v47 = vld [vmem:[#allocation2 + $0x49] sm:$0xff]  ;;  %v514_v50 = vmul.f32 0.24420135, %v506_v36 }
 0x1dc   : > { %v459_v42 = vld [vmem:[#allocation2 + $0x21] sm:$0xff]  ;;  %v470_v48 = vmul.f32 0.24420135, %v462_v47  ;;  %v538_v52 = vmul.f32 0.054488685, %v530_v40  ;;  %v463_v56 = vld [vmem:[#allocation2 + $0x51] sm:$0xff] }
 0x1dd   : > { %v467_v44 = vmul.f32 0.24420135, %v459_v42  ;;  %v498_v49 = vadd.f32 %v490_v35, %v474_v39  ;;  %v486_v58 = vld [vmem:[#allocation2 + $0x4a] sm:$0xff]  ;;  %v455_v59 = vmul.f32 0.054488685, %v447_v55  ;;  %v511_v21 = vld [vmem:[#allocation2 + $0x53] sm:$0xff] }
 0x1de   : > { %v471_v60 = vmul.f32 0.24420135, %v463_v56  ;;  %v478_v3 = vadd.f32 %v470_v48, %v454_v45  ;;  %v494_v11 = vmul.f32 0.40261996, %v486_v58  ;;  %v510_v12 = vld [vmem:[#allocation2 + $0x4b] sm:$0xff]  ;;  %v535_v33 = vld [vmem:[#allocation2 + $0x54] sm:$0xff] }
 0x1df   : > { %v475_v53 = vadd.f32 %v467_v44, %v451_v41  ;;  %v522_v57 = vadd.f32 %v514_v50, %v498_v49  ;;  %v508_v63 = vld [vmem:[#allocation2 + $0x33] sm:$0xff]  ;;  %v495_v17 = vmul.f32 0.40261996, %v487_v0  ;;  %v509_v19 = vld [vmem:[#allocation2 + $0x3b] sm:$0xff]  ;;  %v518_v27 = vmul.f32 0.24420135, %v510_v12 }
 0x1e0   : > { %v532_v1 = vld [vmem:[#allocation2 + $0x34] sm:$0xff]  ;;  %v516_v6 = vmul.f32 0.24420135, %v508_v63  ;;  %v479_v13 = vadd.f32 %v471_v60, %v455_v59  ;;  %v502_v20 = vadd.f32 %v494_v11, %v478_v3  ;;  %v533_v26 = vld [vmem:[#allocation2 + $0x3c] sm:$0xff]  ;;  %v517_v29 = vmul.f32 0.24420135, %v509_v19 }
 0x1e1   : > { %v499_v61 = vadd.f32 %v491_v38, %v475_v53  ;;  %v445_v2 = vld [vmem:[#allocation2 + $0x38] sm:$0xff]  ;;  %v546_v4 = vadd.f32 %v538_v52, %v522_v57  ;;  %v540_v15 = vmul.f32 0.054488685, %v532_v1  ;;  %v534_v30 = vld [vmem:[#allocation2 + $0x4c] sm:$0xff]  ;;  %v519_v31 = vmul.f32 0.24420135, %v511_v21 }
 0x1e2   : > { %v453_v7 = vmul.f32 0.054488685, %v445_v2  ;;  %v461_v9 = vld [vmem:[#allocation2 + $0x39] sm:$0xff]  ;;  %v524_v14 = vadd.f32 %v516_v6, %v500_v5  ;;  %v503_v25 = vadd.f32 %v495_v17, %v479_v13  ;;  %v526_v32 = vadd.f32 %v518_v27, %v502_v20 }
 0x1e3   : > { %v523_v8 = vadd.f32 %v515_v54, %v499_v61  ;;  %v485_v10 = vld [vmem:[#allocation2 + $0x3a] sm:$0xff]  ;;  %564 = vrot.lane.b32.xlu2 %v546_v4, %s862_s26  ;;  %v469_v16 = vmul.f32 0.24420135, %v461_v9  ;;  %v541_v35 = vmul.f32 0.054488685, %v533_v26 }
 0x1e4   : > { %v548_v22 = vadd.f32 %v540_v15, %v524_v14  ;;  %v493_v24 = vmul.f32 0.40261996, %v485_v10  ;;  %v527_v36 = vadd.f32 %v519_v31, %v503_v25  ;;  %v542_v37 = vmul.f32 0.054488685, %v534_v30 }
 0x1e5   : > { %v547_v18 = vadd.f32 %v539_v62, %v523_v8  ;;  %v477_v23 = vadd.f32 %v469_v16, %v453_v7  ;;  %v543_v39 = vmul.f32 0.054488685, %v535_v33 }
 0x1e6   : > { %568 = vrot.lane.b32.xlu1 %v548_v22, %s862_s26  ;;  %v550_v40 = vadd.f32 %v542_v37, %v526_v32 }
 0x1e7   : > { %566 = vrot.lane.b32.xlu0 %v547_v18, %s862_s26  ;;  %v501_v28 = vadd.f32 %v493_v24, %v477_v23  ;;  %v551_v41 = vadd.f32 %v543_v39, %v527_v36 }
 0x1e9   : > { %v525_v34 = vadd.f32 %v517_v29, %v501_v28 }
 0x1eb   : > { %v549_v38 = vadd.f32 %v541_v35, %v525_v34 }
 0x1ed   : > { %570 = vrot.lane.b32.xlu2 %v549_v38, %s862_s26 }
 0x1ee   : > { %574 = vrot.lane.b32.xlu1 %v551_v41, %s862_s26 }
 0x1ef   : > { %572 = vrot.lane.b32.xlu0 %v550_v40, %s862_s26 }
 0x23d   : > { %v565_v42 = vpop.permute.xlu2 %564 }
 0x23e   : > { %587 = vst.msk [vmem:[%s137_s29 + $0x10] sm:$0xff] %vm584_vm4, %v565_v42 }
 0x247   : > { %v571_v43 = vpop.permute.xlu2 %570 }
 0x248   : > { %590 = vst.msk [vmem:[%s137_s29 + $0x28] sm:$0xff] %vm584_vm4, %v571_v43  ;;  %v563_v44 = vpop.permute.xlu1 %562  ;;  %v561_v45 = vpop.permute.xlu0 %560 }
 0x249   : > { %586 = vst.msk [vmem:[%s137_s29 + $0x8] sm:$0xff] %vm584_vm4, %v563_v44 }
 0x24a   : > { %585 = vst.msk [vmem:[%s137_s29] sm:$0xff] %vm584_vm4, %v561_v45 }
 0x258   : > { %v569_v49 = vpop.permute.xlu1 %568 }
 0x259   : > { %v567_v47 = vpop.permute.xlu0 %566  ;;  %589 = vst.msk [vmem:[%s137_s29 + $0x20] sm:$0xff] %vm584_vm4, %v569_v49 }
 0x25a   : > { %588 = vst.msk [vmem:[%s137_s29 + $0x18] sm:$0xff] %vm584_vm4, %v567_v47 }
 0x260   : > { %v575_v51 = vpop.permute.xlu1 %574 }
 0x261   : > { %v573_v50 = vpop.permute.xlu0 %572  ;;  %592 = vst.msk [vmem:[%s137_s29 + $0x38] sm:$0xff] %vm584_vm4, %v575_v51 }
 0x262   : > { %591 = vst.msk [vmem:[%s137_s29 + $0x30] sm:$0xff] %vm584_vm4, %v573_v50 }
 0x263   : > { %816 = shalt.err (!%p813_p4)
}
 0x264   : > { %s865_s21 = smov 128   ;;  %s866_s17 = smov 8  }
 0x265   : > { %705 = dma.vmem_to_hbm [thread:$0]  (%p927_p11), %s608_s5, 1024, %s610_s11, %s594_s10, %s865_s21, %s865_s21, %s866_s17  }
 0x266 PF: > { %s624_s25 = sand.u32 1, %s843_s6   ;;  %p1137_p7 = scmp.ge.s32.totalorder %s855_s9, 2 }
 0x267   : > { %s625_s26 = scalar_lea.sflag [#allocation5], %s624_s25 }
 0x268   : > { %p712_p5 = pnand %p1137_p7, %p931_p12 }
 0x26a   : > { %p713_p8 = pneg %p712_p5 }
 0x26c   : > { %838 = dma.done.wait (%p713_p8), %s625_s26, 1024  }
 0x26d   : > { %840 = vsyncadd (%p713_p8), %s625_s26, 4294966272  ;;  %p14_p10 = scmp.ge.s32.totalorder %s902_s12, 4   ;;  %s1138_s6 = smov %s847_s7 }
 0x26e   : > { %s1139_s7 = smov %s851_s8  ;;  %s1140_s8 = smov %s914_s15 }
 0x26f   : > { %s1141_s9 = smov %s902_s12  ;;  %16 = sbr.rel (!%p14_p10) target bundleno = 5 (0x5), region = 69 }
 0x274   :  { %631 = vsyncpa [#allocation4], 1 }
 0x275   :  { %633 = vsyncpa [#allocation4 + $0x1], 1 }
 0x276   :  { %634 = vsyncpa [#allocation5], 1 }
 0x277   :  { %636 = vsyncpa [#allocation5 + $0x1], 1 }

</bundles_post_ra>
